<compile_context>
chip_gen: v6e
topology: v6e:2x2x1
jax: 0.10.0
libtpu: 0.0.40
codegen_flags: <defaults>
</compile_context>

<pallas_src>
import numpy as np

import jax
import jax.numpy as jnp
from jax.experimental import pallas as pl
from jax.experimental.pallas import tpu as pltpu


def _decomp_kernel(w_ref, x_ref, res_ref, mean_ref):
    # w_ref   : (L, L)      banded averaging weights (f32, constant block)
    # x_ref   : (L, C_blk)  one batch's series block (time on sublanes,
    #                       channels on lanes)
    # res_ref : (L, C_blk)  residual output
    # mean_ref: (L, C_blk)  moving-average (trend) output
    x = x_ref[...].astype(jnp.float32)
    mean = jnp.dot(
        w_ref[...], x,
        preferred_element_type=jnp.float32,
        precision=jax.lax.Precision.HIGHEST)
    mean_ref[...] = mean.astype(mean_ref.dtype)
    res_ref[...] = (x - mean).astype(res_ref.dtype)


def _moving_avg_weights(seq_len, kernel_size):
    """(L, L) f32 matrix: row t holds 1/K over the replicate-padded window."""
    pad = (kernel_size - 1) // 2
    t = np.arange(seq_len)[:, None]
    i = np.arange(kernel_size)[None, :]
    src = np.clip(t - pad + i, 0, seq_len - 1)          # clamp == replicate pad
    w = np.zeros((seq_len, seq_len), dtype=np.float32)
    np.add.at(
        w,
        (np.broadcast_to(t, src.shape).ravel(), src.ravel()),
        np.float32(1.0 / kernel_size))
    return w


def series_decomp(x, kernel_size):
    """Series decomposition: returns (res, moving_mean), both shaped like x."""
    assert kernel_size >= 1 and kernel_size % 2 == 1, (
        "kernel_size must be odd so output length == input length")
    B, L, C = x.shape

    w = jnp.asarray(_moving_avg_weights(L, kernel_size))

    # Channel (lane) chunking: keep each (L, c_blk) f32 buffer around <= ~2 MiB
    # so double-buffered in/outs plus the f32 temporaries stay well below
    # v7x's 64 MiB physical VMEM (v5e/v6e have 128 MiB; same budget is fine).
    max_c = max(128, (((2 << 20) // (4 * L)) // 128) * 128)
    c_blk = C if C <= max_c else max_c
    nc = pl.cdiv(C, c_blk)
    # NOTE: a ragged final channel chunk reads garbage in the out-of-range
    # lanes; those lanes are masked on writeback, never read across steps.

    blk_bytes = 4 * L * c_blk
    w_bytes = 4 * L * L
    # double-buffered W + double-buffered in/outs + f32 temporaries, x2 slack
    vmem_need = 2 * w_bytes + 3 * 2 * blk_bytes + 4 * blk_bytes
    vmem_limit = int(min(64 << 20, max(16 << 20, 2 * vmem_need)))

    res, mean = pl.pallas_call(
        _decomp_kernel,
        out_shape=(
            jax.ShapeDtypeStruct((B, L, C), x.dtype),
            jax.ShapeDtypeStruct((B, L, C), x.dtype),
        ),
        grid_spec=pltpu.PrefetchScalarGridSpec(
            num_scalar_prefetch=0,
            grid=(B, nc),
            in_specs=[
                pl.BlockSpec((L, L), lambda b, c: (0, 0)),          # W (reused)
                pl.BlockSpec((None, L, c_blk), lambda b, c: (b, 0, c)),
            ],
            out_specs=[
                pl.BlockSpec((None, L, c_blk), lambda b, c: (b, 0, c)),
                pl.BlockSpec((None, L, c_blk), lambda b, c: (b, 0, c)),
            ],
        ),
        compiler_params=pltpu.CompilerParams(
            dimension_semantics=("parallel", "parallel"),
            vmem_limit_bytes=vmem_limit),
    )(w, x)
    return res, mean


def _reference(x, kernel_size):
    pad = (kernel_size - 1) // 2
    front = jnp.repeat(x[:, :1, :], pad, axis=1)
    end = jnp.repeat(x[:, -1:, :], pad, axis=1)
    xpad = jnp.concatenate([front, x, end], axis=1)
    L = x.shape[1]
    mean = jnp.stack(
        [xpad[:, k:k + L, :] for k in range(kernel_size)], axis=0
    ).mean(axis=0)
    return x - mean, mean


if __name__ == "__main__":
    key = jax.random.PRNGKey(0)
    configs = [
        (2, 16, 8, 5),     # small smoke test
        (2, 48, 8, 25),    # DLinear default kernel_size
        (1, 64, 200, 13),  # >128 channels on the lane axis, single batch
    ]
    for (B, L, C, K) in configs:
        key, sub = jax.random.split(key)
        x = jax.random.normal(sub, (B, L, C), dtype=jnp.float32)

        res, mean = series_decomp(x, K)
        res, mean = jax.block_until_ready((res, mean))

        res_ref, mean_ref = _reference(x, K)
        assert jnp.allclose(mean, mean_ref, atol=1e-5, rtol=1e-5), (B, L, C, K)
        assert jnp.allclose(res, res_ref, atol=1e-5, rtol=1e-5), (B, L, C, K)

    print("KERNEL_OK")
</pallas_src>

<mosaic_0001>
module attributes {stable_mosaic.version = 11 : i64} {
  func.func @_decomp_kernel(%arg0: i32, %arg1: i32, %arg2: memref<16x16xf32, #tpu.memory_space<vmem>>, %arg3: memref<1x16x8xf32, #tpu.memory_space<vmem>>, %arg4: memref<1x16x8xf32, #tpu.memory_space<vmem>>, %arg5: memref<1x16x8xf32, #tpu.memory_space<vmem>>) attributes {dimension_semantics = [#tpu.dimension_semantics<parallel>, #tpu.dimension_semantics<parallel>], iteration_bounds = array<i64: 2, 1>, scalar_prefetch = 0 : i64, scratch_operands = 0 : i64, tpu.core_type = #tpu.core_type<tc>, window_params = [{pipeline_mode = #tpu.pipeline_mode<synchronous>, transform_indices = @transform_0, window_bounds = array<i64: 16, 16>}, {transform_indices = @transform_1, window_bounds = array<i64: 1, 16, 8>}, {transform_indices = @transform_2, window_bounds = array<i64: 1, 16, 8>}, {transform_indices = @transform_3, window_bounds = array<i64: 1, 16, 8>}]} {
    %c0 = arith.constant 0 : index
    %c0_0 = arith.constant 0 : index
    %c0_1 = arith.constant 0 : index
    %0 = vector.load %arg3[%c0, %c0_0, %c0_1] : memref<1x16x8xf32, #tpu.memory_space<vmem>>, vector<1x16x8xf32>
    %1 = vector.shape_cast %0 : vector<1x16x8xf32> to vector<16x8xf32>
    %c0_2 = arith.constant 0 : index
    %c0_3 = arith.constant 0 : index
    %2 = vector.load %arg2[%c0_2, %c0_3] : memref<16x16xf32, #tpu.memory_space<vmem>>, vector<16x16xf32>
    %cst = arith.constant dense<0.000000e+00> : vector<16x8xf32>
    %3 = tpu.matmul %2, %1, %cst {dimension_numbers = #tpu.dot_dimension_numbers<[1], [0], [0], [1], [0, 0, 1, 1], [], []>, precision = #tpu.contract_precision<fp32>} : vector<16x16xf32>, vector<16x8xf32>, vector<16x8xf32> -> vector<16x8xf32>
    %c0_4 = arith.constant 0 : index
    %c0_5 = arith.constant 0 : index
    %c0_6 = arith.constant 0 : index
    %4 = vector.load %arg5[%c0_4, %c0_5, %c0_6] : memref<1x16x8xf32, #tpu.memory_space<vmem>>, vector<1x16x8xf32>
    %5 = vector.shape_cast %4 : vector<1x16x8xf32> to vector<16x8xf32>
    %6 = vector.shape_cast %3 : vector<16x8xf32> to vector<1x16x8xf32>
    tpu.vector_store %arg5[%c0_4, %c0_5, %c0_6], %6 {strides = array<i32>} : memref<1x16x8xf32, #tpu.memory_space<vmem>>, vector<1x16x8xf32>,
    %7 = arith.subf %1, %3 : vector<16x8xf32>
    %c0_7 = arith.constant 0 : index
    %c0_8 = arith.constant 0 : index
    %c0_9 = arith.constant 0 : index
    %8 = vector.load %arg4[%c0_7, %c0_8, %c0_9] : memref<1x16x8xf32, #tpu.memory_space<vmem>>, vector<1x16x8xf32>
    %9 = vector.shape_cast %8 : vector<1x16x8xf32> to vector<16x8xf32>
    %10 = vector.shape_cast %7 : vector<16x8xf32> to vector<1x16x8xf32>
    tpu.vector_store %arg4[%c0_7, %c0_8, %c0_9], %10 {strides = array<i32>} : memref<1x16x8xf32, #tpu.memory_space<vmem>>, vector<1x16x8xf32>,
    return
  }
  func.func @transform_0(%arg0: i32, %arg1: i32) -> (i32, i32) {
    %c0_i32 = arith.constant 0 : i32
    %c0_i32_0 = arith.constant 0 : i32
    %c0_i32_1 = arith.constant 0 : i32
    return %c0_i32, %c0_i32_0 : i32, i32
  }
  func.func @transform_1(%arg0: i32, %arg1: i32) -> (i32, i32, i32) {
    %c0_i32 = arith.constant 0 : i32
    %c0_i32_0 = arith.constant 0 : i32
    return %arg0, %c0_i32, %arg1 : i32, i32, i32
  }
  func.func @transform_2(%arg0: i32, %arg1: i32) -> (i32, i32, i32) {
    %c0_i32 = arith.constant 0 : i32
    %c0_i32_0 = arith.constant 0 : i32
    return %arg0, %c0_i32, %arg1 : i32, i32, i32
  }
  func.func @transform_3(%arg0: i32, %arg1: i32) -> (i32, i32, i32) {
    %c0_i32 = arith.constant 0 : i32
    %c0_i32_0 = arith.constant 0 : i32
    return %arg0, %c0_i32, %arg1 : i32, i32, i32
  }
}

</mosaic_0001>

<bundles_post_ra>
// kernel: tpu_custom_call.1
= control target key start
LH: loop header
LB: loop body
LE: loop exit
PB: predicated region body
PF: predicated region fallthrough
CT: control target
= control target key end

     0   :  { %s1023_s12 = smov 0   ;;  %s1025_s13 = smov 0   ;;  %s1080_s0 = inlined_call_operand.vmem [shape: f32[16,16], index: 0, kind: input, shape index: {}]   ;;  %s1081_s1 = inlined_call_operand.vmem [shape: f32[2,16,8], index: 1, kind: input, shape index: {}]   ;;  %s1082_s2 = inlined_call_operand.vmem [shape: f32[2,16,8], index: 2, kind: output, shape index: {0}]   ;;  %s1083_s3 = inlined_call_operand.vmem [shape: f32[2,16,8], index: 3, kind: output, shape index: {1}]  }
   0x1   :  { %s1027_s14 = smov 0  }
   0x2 LB: > { %s26_s15 = sadd.s32 1, %s997_s13  ;;  %p877_p0 = scmp.ge.s32.totalorder %s1001_s14, 1  ;;  %s1001_s14 = sphi %s1027_s14, %s14_s14   ;;  %s997_s13 = sphi %s1025_s13, %s1085_s13   ;;  %s993_s12 = sphi %s1023_s12, %s1084_s12  }
   0x3   : > { %p28_p1 = scmp.ge.s32.totalorder %s26_s15, 2  ;;  %p161_p2 = scmp.lt.s32.totalorder %s1001_s14, 3 }
   0x5   : > { %s1087_s15 = smov (%p28_p1, %s26_s15), 0  ;;  %p162_p3 = pnand %p877_p0, %p161_p2 }
   0x6   : > { %p199_p4 = scmp.lt.s32.totalorder (!%p162_p3), %s993_s12, 1 }
   0x7   : > { %165 = sbr.rel (%p162_p3) target bundleno = 240 (0xf0), region = 28 }
   0xc   : > { %v225_v0 = vld [vmem:[%s1080_s0] sm:$0xff]  ;;  %v226_v1 = vld [vmem:[%s1080_s0 + $0x8] sm:$0xff]  ;;  %vm227_vm0 = vcmask 130048   ;;  %s1089_s12 = smov (!%p199_p4, %s993_s12), 1  ;;  %vm736_vm1 = vcmask 64512  }
   0xd   : > { %v229_v2 = vsel %vm227_vm0, %v225_v0, 0  ;;  %v232_v3 = vsel %vm227_vm0, %v226_v1, 0  ;;  %s1047_s20 = sshll.u32 %s1089_s12, 4 }
   0xe   : > { %v301_v4 = vand.u32 4294901760, %v229_v2  ;;  %v311_v5 = vand.u32 4294901760, %v232_v3  ;;  %s206_s23 = scalar_lea.vmem %s1081_s1, %s1047_s20  ;;  %s222_s26 = scalar_lea.vmem %s1083_s3, %s1047_s20 }
   0xf   : > { %v1053_v8 = vld [vmem:[%s206_s23 + $0x8] sm:$0xff]  ;;  %v1055_v9 = vld [vmem:[%s206_s23] sm:$0xff]  ;;  %s214_s29 = scalar_lea.vmem %s1082_s2, %s1047_s20 }
  0x10   : > { %v302_v6 = vsub.f32 %v229_v2, %v301_v4  ;;  %v312_v7 = vsub.f32 %v232_v3, %v311_v5  ;;  %924 = vmatprep.mubr.f32.mxu1 %v301_v4  ;;  %v263_v12 = vand.u32 4294901760, %v1053_v8  ;;  %v266_v13 = vand.u32 4294901760, %v1055_v9 }
  0x12   : > { %v303_v10 = vand.u32 4294901760, %v302_v6  ;;  %v313_v11 = vand.u32 4294901760, %v312_v7  ;;  %913 = vmatprep.subr.mxu0 %v263_v12  ;;  %v351_v16 = vsub.f32 %v1053_v8, %v263_v12  ;;  %v358_v17 = vsub.f32 %v1055_v9, %v266_v13 }
  0x13   : > { %914 = vmatpush3.msra.mxu0 %v263_v12 }
  0x14   : > { %v304_v14 = vsub.f32 %v302_v6, %v303_v10  ;;  %v314_v15 = vsub.f32 %v312_v7, %v313_v11  ;;  %915 = vmatprep.subr.mxu0 %v266_v13  ;;  %v352_v20 = vand.u32 4294901760, %v351_v16  ;;  %v359_v21 = vand.u32 4294901760, %v358_v17 }
  0x15   : > { %916 = vmatpush3.msra.mxu0 %v266_v13 }
  0x16   : > { %v305_v18 = vand.u32 4294901760, %v304_v14  ;;  %v315_v19 = vand.u32 4294901760, %v314_v15  ;;  %v353_v22 = vsub.f32 %v351_v16, %v352_v20  ;;  %927 = vmatprep.subr.mxu0 %v351_v16  ;;  %v360_v23 = vsub.f32 %v358_v17, %v359_v21 }
  0x18   : > { %917 = vmatprep.mubr.f32.mxu0 %v305_v18  ;;  %v354_v24 = vand.u32 4294901760, %v353_v22  ;;  %v361_v25 = vand.u32 4294901760, %v360_v23 }
  0x19   : > { %918 = vmatmul.mubr.f32.vlgmr.msra.gmra.mxu0 %v315_v19 }
  0x1a   : > { %928 = vmatpush3.msra.mxu0 %v351_v16  ;;  %931 = vmatprep.mubr.f32.mxu0 %v302_v6 }
  0x1b   : > { %929 = vmatprep.subr.mxu0 %v358_v17  ;;  %920 = vmatprep.subr.mxu1 %v354_v24 }
  0x1c   : > { %930 = vmatpush3.msra.mxu0 %v358_v17  ;;  %921 = vmatpush3.msra.mxu1 %v354_v24 }
  0x1d   : > { %932 = vmatmul.mubr.f32.vlgmr.msra.gmra.mxu0 %v312_v7  ;;  %941 = vmatprep.subr.mxu0 %v352_v20 }
  0x1e   : > { %922 = vmatprep.subr.mxu1 %v361_v25  ;;  %942 = vmatpush3.msra.mxu0 %v352_v20 }
  0x1f   : > { %923 = vmatpush3.msra.mxu1 %v361_v25  ;;  %943 = vmatprep.subr.mxu0 %v359_v21 }
  0x20   : > { %925 = vmatmul.mubr.f32.vlgmr.msra.gmra.mxu1 %v311_v5  ;;  %934 = vmatprep.subr.mxu1 %v263_v12 }
  0x21   : > { %935 = vmatpush3.msra.mxu1 %v263_v12  ;;  %938 = vmatprep.mubr.f32.mxu1 %v303_v10 }
  0x22   : > { %936 = vmatprep.subr.mxu1 %v266_v13  ;;  %944 = vmatpush3.msra.mxu0 %v359_v21 }
  0x23   : > { %937 = vmatpush3.msra.mxu1 %v266_v13  ;;  %945 = vmatprep.mubr.f32.mxu0 %v301_v4 }
  0x24   : > { %939 = vmatmul.mubr.f32.vlgmr.msra.gmra.mxu1 %v313_v11  ;;  %948 = vmatprep.subr.mxu1 %v263_v12 }
  0x25   : > { %946 = vmatmul.mubr.f32.vlgmr.msra.gmra.mxu0 %v311_v5  ;;  %949 = vmatpush3.msra.mxu1 %v263_v12 }
  0x26   : > { %950 = vmatprep.subr.mxu1 %v266_v13  ;;  %952 = vmatprep.mubr.f32.mxu1 %v301_v4 }
  0x27   : > { %951 = vmatpush3.msra.mxu1 %v266_v13 }
  0x28   : > { %953 = vmatmul.mubr.f32.vlgmr.msra.gmra.mxu1 %v311_v5 }
  0xd9   : > { %v919_v26 = vpop.f32.mrf.mxu0 }
  0xdb   : > { %v307_v27 = vpop.f32.mrf.mxu0 }
  0xdd   : > { %v933_v28 = vpop.f32.mrf.mxu0 }
  0xdf   : > { %v480_v31 = vpop.f32.mrf.mxu0 }
  0xe0   : > { %v926_v29 = vpop.f32.mrf.mxu1 }
  0xe1   : > { %v405_v30 = vadd.f32 %v926_v29, %v919_v26 }
  0xe2   : > { %v398_v32 = vpop.f32.mrf.mxu1 }
  0xe3   : > { %v488_v33 = vadd.f32 %v933_v28, %v405_v30  ;;  %v399_v34 = vadd.f32 %v398_v32, %v307_v27 }
  0xe4   : > { %v940_v35 = vpop.f32.mrf.mxu1 }
  0xe5   : > { %v481_v36 = vadd.f32 %v480_v31, %v399_v34  ;;  %v571_v37 = vadd.f32 %v940_v35, %v488_v33  ;;  %v947_v38 = vpop.f32.mrf.mxu0 }
  0xe6   : > { %v562_v39 = vpop.f32.mrf.mxu1 }
  0xe7   : > { %v654_v40 = vadd.f32 %v947_v38, %v571_v37  ;;  %v563_v41 = vadd.f32 %v562_v39, %v481_v36  ;;  %v647_v42 = vpop.f32.mrf.mxu0 }
  0xe8   : > { %v954_v43 = vpop.f32.mrf.mxu1 }
  0xe9   : > { %v648_v44 = vadd.f32 %v647_v42, %v563_v41  ;;  %v733_v45 = vadd.f32 %v954_v43, %v654_v40 }
  0xea   : > { %v726_v46 = vpop.f32.mrf.mxu1 }
  0xeb   : > { %738 = vst.msk [vmem:[%s222_s26 + $0x8] sm:$0xff] %vm736_vm1, %v733_v45  ;;  %v740_v47 = vsub.f32 %v1053_v8, %v733_v45  ;;  %v727_v48 = vadd.f32 %v726_v46, %v648_v44 }
  0xed   : > { %742 = vst.msk [vmem:[%s214_s29 + $0x8] sm:$0xff] %vm736_vm1, %v740_v47  ;;  %737 = vst.msk [vmem:[%s222_s26] sm:$0xff] %vm736_vm1, %v727_v48  ;;  %v739_v49 = vsub.f32 %v1055_v9, %v727_v48 }
  0xef   : > { %741 = vst.msk [vmem:[%s214_s29] sm:$0xff] %vm736_vm1, %v739_v49 }
  0xf0 PF: > { %s14_s14 = sadd.s32 1, %s1001_s14   ;;  %s1084_s12 = smov %s997_s13 }
  0xf1   : > { %p11_p5 = scmp.ge.s32.totalorder %s14_s14, 4   ;;  %s1085_s13 = smov %s1087_s15 }
  0xf3   :  { %13 = sbr.rel (!%p11_p5) target bundleno = 2 (0x2), region = 70 }

</bundles_post_ra>
